<compile_context>
chip_gen: v6e
topology: v6e:2x2x1
jax: 0.10.0
libtpu: 0.0.40
codegen_flags: <defaults>
</compile_context>

<pallas_src>
import functools

import jax
import jax.numpy as jnp
from jax.experimental import pallas as pl
from jax.experimental.pallas import tpu as pltpu

LANE = 128
SUBLANE = 8
MAX_TILE_ROWS = 2048   # 2048*128*4B = 1 MiB per input tile; 2 inputs x 2 bufs = 4 MiB VMEM
NUM_CORES = 2          # leading 'parallel' grid axis (megacore / v7x 2-TC split)


def _focal_loss_kernel(x_ref, y_ref, out_ref, *, alpha, gamma, total,
                       num_tiles, tiles_per_core):
    c = pl.program_id(0)           # parallel (core) axis
    i = pl.program_id(1)           # arbitrary (reduction) axis
    g = c * tiles_per_core + i     # global tile index (>= num_tiles => phantom step)

    # Zero this core's partial-sum block at its first step.
    @pl.when(i == 0)
    def _():
        out_ref[...] = jnp.zeros_like(out_ref)

    x = x_ref[...].astype(jnp.float32)   # logits tile (tile_rows, LANE)
    y = y_ref[...].astype(jnp.float32)   # labels tile (tile_rows, LANE)

    # Fused numerically-stable log-sigmoid math (1 exp + 1 log1p + 1 divide):
    #   log(p)    = min(x, 0)  - log1p(exp(-|x|))
    #   log(1-p)  = min(-x, 0) - log1p(exp(-|x|))
    #   p         = 1/(1+e) if x >= 0 else e/(1+e),  e = exp(-|x|)
    # This matches the torch softplus(+/-1, threshold=50) construction exactly.
    e = jnp.exp(-jnp.abs(x))
    lp = jnp.log1p(e)
    log_probs = jnp.minimum(x, 0.0) - lp
    log_1_probs = jnp.minimum(-x, 0.0) - lp
    r = 1.0 / (1.0 + e)
    probs = jnp.where(x >= 0.0, r, e * r)

    t = y - probs
    if float(gamma) == 2.0:
        coeff = -(t * t)                 # fast path: no pow -> no extra EUP traffic
    elif float(gamma) == 1.0:
        coeff = -jnp.abs(t)
    else:
        coeff = -jnp.power(jnp.abs(t), jnp.float32(gamma))

    loss = (y * alpha * log_probs + (1.0 - y) * (1.0 - alpha) * log_1_probs) * coeff

    tile_rows = loss.shape[0]

    def _accumulate(vals):
        # (tile_rows, LANE) -> (8, LANE) per-lane partial sums: pure VPU adds
        # across vregs, no cross-lane reduction on the per-step critical path.
        out_ref[...] += vals.reshape(tile_rows // SUBLANE, SUBLANE, LANE).sum(axis=0)

    # Non-tail tiles: fully valid, no masking needed.
    @pl.when(g < num_tiles - 1)
    def _():
        _accumulate(loss)

    # Tail tile only: mask padded / ragged elements (global index >= total).
    # Phantom steps (g >= num_tiles) skip accumulation entirely.
    @pl.when(g == num_tiles - 1)
    def _():
        row = jax.lax.broadcasted_iota(jnp.int32, (tile_rows, LANE), 0)
        col = jax.lax.broadcasted_iota(jnp.int32, (tile_rows, LANE), 1)
        gidx = (g * tile_rows + row) * LANE + col   # int32 is fine below ~2^31 elements
        _accumulate(jnp.where(gidx < total, loss, 0.0))


def focal_loss(logits, label, alpha=0.25, gamma=2.0, reduction="mean",
               *, max_tile_rows=MAX_TILE_ROWS):
    assert reduction in ("mean", "sum")
    # TODO(synk): reduction='none' (per-element output) not wired up here; the
    # module's default (and the tested path) is 'mean'.
    total = int(logits.size)
    assert total > 0

    x = logits.reshape(-1)
    y = label.reshape(-1)

    # Pad only the tail up to one (8,128) vreg so the flat array reshapes to a
    # lane-dense (rows, 128) layout; the padded elements are masked in-kernel.
    chunk = SUBLANE * LANE
    padded = pl.cdiv(total, chunk) * chunk
    if padded != total:
        x = jnp.pad(x, (0, padded - total))
        y = jnp.pad(y, (0, padded - total))
    rows = padded // LANE                       # always a multiple of 8
    x2 = x.reshape(rows, LANE)
    y2 = y.reshape(rows, LANE)

    tile_rows = min(int(max_tile_rows), rows)   # multiple of 8 (or full extent)
    num_tiles = pl.cdiv(rows, tile_rows)
    tiles_per_core = pl.cdiv(num_tiles, NUM_CORES)

    def in_map(c, i):
        # Clamp phantom steps (core ran out of real tiles) onto the last tile;
        # the kernel skips accumulation for them.
        return (jnp.minimum(c * tiles_per_core + i, num_tiles - 1), 0)

    kernel = functools.partial(
        _focal_loss_kernel, alpha=float(alpha), gamma=float(gamma),
        total=total, num_tiles=num_tiles, tiles_per_core=tiles_per_core)

    partials = pl.pallas_call(
        kernel,
        out_shape=jax.ShapeDtypeStruct((NUM_CORES, SUBLANE, LANE), jnp.float32),
        grid=(NUM_CORES, tiles_per_core),
        in_specs=[
            pl.BlockSpec((tile_rows, LANE), in_map),
            pl.BlockSpec((tile_rows, LANE), in_map),
        ],
        out_specs=pl.BlockSpec((None, SUBLANE, LANE), lambda c, i: (c, 0, 0)),
        compiler_params=pltpu.CompilerParams(
            dimension_semantics=("parallel", "arbitrary")),
    )(x2, y2)

    loss_sum = jnp.sum(partials)                # tiny (2*8*128) final reduce
    if reduction == "mean":
        return loss_sum / jnp.float32(total)
    return loss_sum


def _focal_loss_ref(logits, label, alpha=0.25, gamma=2.0, reduction="mean"):
    """Pure-JAX reference mirroring the PyTorch module exactly."""
    logits = logits.astype(jnp.float32)
    label = label.astype(jnp.float32)
    probs = jax.nn.sigmoid(logits)
    coeff = -jnp.power(jnp.abs(label - probs), gamma)
    log_probs = jnp.where(logits >= 0,
                          -jnp.log1p(jnp.exp(-logits)),
                          logits - jnp.log1p(jnp.exp(logits)))
    log_1_probs = jnp.where(logits >= 0,
                            -logits - jnp.log1p(jnp.exp(-logits)),
                            -jnp.log1p(jnp.exp(logits)))
    loss = label * alpha * log_probs + (1.0 - label) * (1.0 - alpha) * log_1_probs
    loss = loss * coeff
    if reduction == "mean":
        return jnp.mean(loss)
    if reduction == "sum":
        return jnp.sum(loss)
    return loss


if __name__ == "__main__":
    key = jax.random.PRNGKey(0)
    k1, k2, k3, k4 = jax.random.split(key, 4)

    # Primary check: NCHW logits + binary float labels, default 'mean'.
    logits = jax.random.normal(k1, (2, 4, 16, 16), dtype=jnp.float32)
    label = jax.random.bernoulli(k2, 0.5, (2, 4, 16, 16)).astype(jnp.float32)
    out = jax.block_until_ready(focal_loss(logits, label, alpha=0.25, gamma=2.0))
    ref = _focal_loss_ref(logits, label, alpha=0.25, gamma=2.0)
    assert jnp.allclose(out, ref, atol=1e-5, rtol=1e-5), (out, ref)

    # Multi-tile + uneven core split (3 tiles over 2 cores -> one phantom step).
    logits2 = jax.random.normal(k3, (3, 4, 16, 16), dtype=jnp.float32)
    label2 = jax.random.bernoulli(k4, 0.5, (3, 4, 16, 16)).astype(jnp.float32)
    out2 = jax.block_until_ready(focal_loss(logits2, label2, max_tile_rows=8))
    ref2 = _focal_loss_ref(logits2, label2)
    assert jnp.allclose(out2, ref2, atol=1e-5, rtol=1e-5), (out2, ref2)

    # Ragged size (not a multiple of 1024) + 'sum' reduction exercises the mask.
    logits3 = jax.random.normal(k1, (3, 5, 7, 11), dtype=jnp.float32)
    label3 = jax.random.bernoulli(k2, 0.5, (3, 5, 7, 11)).astype(jnp.float32)
    out3 = jax.block_until_ready(focal_loss(logits3, label3, reduction="sum"))
    ref3 = _focal_loss_ref(logits3, label3, reduction="sum")
    assert jnp.allclose(out3, ref3, atol=1e-4, rtol=1e-5), (out3, ref3)

    print("KERNEL_OK")
</pallas_src>

<mosaic_0001>
module attributes {stable_mosaic.version = 11 : i64} {
  func.func @_focal_loss_kernel(%arg0: i32, %arg1: i32, %arg2: memref<16x128xf32, #tpu.memory_space<vmem>>, %arg3: memref<16x128xf32, #tpu.memory_space<vmem>>, %arg4: memref<1x8x128xf32, #tpu.memory_space<vmem>>) attributes {dimension_semantics = [#tpu.dimension_semantics<parallel>, #tpu.dimension_semantics<arbitrary>], iteration_bounds = array<i64: 2, 1>, scalar_prefetch = 0 : i64, scratch_operands = 0 : i64, tpu.core_type = #tpu.core_type<tc>, window_params = [{transform_indices = @transform_0, window_bounds = array<i64: 16, 128>}, {transform_indices = @transform_1, window_bounds = array<i64: 16, 128>}, {transform_indices = @transform_2, window_bounds = array<i64: 1, 8, 128>}]} {
    %c1_i32 = arith.constant 1 : i32
    %0 = arith.muli %arg0, %c1_i32 : i32
    %1 = arith.addi %0, %arg1 : i32
    %c0_i32 = arith.constant 0 : i32
    %2 = arith.cmpi eq, %arg1, %c0_i32 : i32
    %3 = arith.extui %2 : i1 to i32
    %c0_i32_0 = arith.constant 0 : i32
    %4 = arith.cmpi ne, %3, %c0_i32_0 : i32
    scf.if %4 {
      %cst_18 = arith.constant 0.000000e+00 : f32
      %48 = vector.broadcast %cst_18 : f32 to vector<8x128xf32>
      %c0_19 = arith.constant 0 : index
      %c0_20 = arith.constant 0 : index
      %c0_21 = arith.constant 0 : index
      %49 = vector.load %arg4[%c0_19, %c0_20, %c0_21] : memref<1x8x128xf32, #tpu.memory_space<vmem>>, vector<1x8x128xf32>
      %50 = vector.shape_cast %49 : vector<1x8x128xf32> to vector<8x128xf32>
      %51 = vector.shape_cast %48 : vector<8x128xf32> to vector<1x8x128xf32>
      tpu.vector_store %arg4[%c0_19, %c0_20, %c0_21], %51 {strides = array<i32>} : memref<1x8x128xf32, #tpu.memory_space<vmem>>, vector<1x8x128xf32>,
    } else {
    }
    %c0 = arith.constant 0 : index
    %c0_1 = arith.constant 0 : index
    %5 = vector.load %arg2[%c0, %c0_1] : memref<16x128xf32, #tpu.memory_space<vmem>>, vector<16x128xf32>
    %c0_2 = arith.constant 0 : index
    %c0_3 = arith.constant 0 : index
    %6 = vector.load %arg3[%c0_2, %c0_3] : memref<16x128xf32, #tpu.memory_space<vmem>>, vector<16x128xf32>
    %7 = math.absf %5 : vector<16x128xf32>
    %cst = arith.constant 0.000000e+00 : f32
    %8 = vector.broadcast %cst : f32 to vector<16x128xf32>
    %9 = arith.subf %8, %7 : vector<16x128xf32>
    %10 = math.exp %9 : vector<16x128xf32>
    %11 = math.log1p %10 : vector<16x128xf32>
    %cst_4 = arith.constant 0.000000e+00 : f32
    %12 = vector.broadcast %cst_4 : f32 to vector<16x128xf32>
    %13 = arith.minimumf %5, %12 : vector<16x128xf32>
    %14 = arith.subf %13, %11 : vector<16x128xf32>
    %cst_5 = arith.constant 0.000000e+00 : f32
    %15 = vector.broadcast %cst_5 : f32 to vector<16x128xf32>
    %16 = arith.subf %15, %5 : vector<16x128xf32>
    %cst_6 = arith.constant 0.000000e+00 : f32
    %17 = vector.broadcast %cst_6 : f32 to vector<16x128xf32>
    %18 = arith.minimumf %16, %17 : vector<16x128xf32>
    %19 = arith.subf %18, %11 : vector<16x128xf32>
    %cst_7 = arith.constant 1.000000e+00 : f32
    %20 = vector.broadcast %cst_7 : f32 to vector<16x128xf32>
    %21 = arith.addf %20, %10 : vector<16x128xf32>
    %cst_8 = arith.constant 1.000000e+00 : f32
    %22 = vector.broadcast %cst_8 : f32 to vector<16x128xf32>
    %23 = arith.divf %22, %21 : vector<16x128xf32>
    %cst_9 = arith.constant 0.000000e+00 : f32
    %24 = vector.broadcast %cst_9 : f32 to vector<16x128xf32>
    %25 = arith.cmpf oge, %5, %24 : vector<16x128xf32>
    %26 = arith.mulf %10, %23 : vector<16x128xf32>
    %27 = arith.select %25, %23, %26 : vector<16x128xi1>, vector<16x128xf32>
    %28 = arith.subf %6, %27 : vector<16x128xf32>
    %29 = arith.mulf %28, %28 : vector<16x128xf32>
    %cst_10 = arith.constant 0.000000e+00 : f32
    %30 = vector.broadcast %cst_10 : f32 to vector<16x128xf32>
    %31 = arith.subf %30, %29 : vector<16x128xf32>
    %cst_11 = arith.constant 2.500000e-01 : f32
    %32 = vector.broadcast %cst_11 : f32 to vector<16x128xf32>
    %33 = arith.mulf %6, %32 : vector<16x128xf32>
    %34 = arith.mulf %33, %14 : vector<16x128xf32>
    %cst_12 = arith.constant 1.000000e+00 : f32
    %35 = vector.broadcast %cst_12 : f32 to vector<16x128xf32>
    %36 = arith.subf %35, %6 : vector<16x128xf32>
    %cst_13 = arith.constant 7.500000e-01 : f32
    %37 = vector.broadcast %cst_13 : f32 to vector<16x128xf32>
    %38 = arith.mulf %36, %37 : vector<16x128xf32>
    %39 = arith.mulf %38, %19 : vector<16x128xf32>
    %40 = arith.addf %34, %39 : vector<16x128xf32>
    %41 = arith.mulf %40, %31 : vector<16x128xf32>
    %c0_i32_14 = arith.constant 0 : i32
    %42 = arith.cmpi slt, %1, %c0_i32_14 : i32
    %43 = arith.extui %42 : i1 to i32
    %c0_i32_15 = arith.constant 0 : i32
    %44 = arith.cmpi ne, %43, %c0_i32_15 : i32
    scf.if %44 {
      %c0_18 = arith.constant 0 : index
      %c0_19 = arith.constant 0 : index
      %c0_20 = arith.constant 0 : index
      %48 = vector.load %arg4[%c0_18, %c0_19, %c0_20] : memref<1x8x128xf32, #tpu.memory_space<vmem>>, vector<1x8x128xf32>
      %49 = vector.shape_cast %48 : vector<1x8x128xf32> to vector<8x128xf32>
      %50 = vector.shape_cast %41 : vector<16x128xf32> to vector<2x8x128xf32>
      %cst_21 = arith.constant dense<0.000000e+00> : vector<8x128xf32>
      %51 = vector.multi_reduction <add>, %50, %cst_21 [0] : vector<2x8x128xf32> to vector<8x128xf32>
      %52 = arith.addf %49, %51 : vector<8x128xf32>
      %c0_22 = arith.constant 0 : index
      %c0_23 = arith.constant 0 : index
      %c0_24 = arith.constant 0 : index
      %53 = vector.load %arg4[%c0_22, %c0_23, %c0_24] : memref<1x8x128xf32, #tpu.memory_space<vmem>>, vector<1x8x128xf32>
      %54 = vector.shape_cast %53 : vector<1x8x128xf32> to vector<8x128xf32>
      %55 = vector.shape_cast %52 : vector<8x128xf32> to vector<1x8x128xf32>
      tpu.vector_store %arg4[%c0_22, %c0_23, %c0_24], %55 {strides = array<i32>} : memref<1x8x128xf32, #tpu.memory_space<vmem>>, vector<1x8x128xf32>,
    } else {
    }
    %c0_i32_16 = arith.constant 0 : i32
    %45 = arith.cmpi eq, %1, %c0_i32_16 : i32
    %46 = arith.extui %45 : i1 to i32
    %c0_i32_17 = arith.constant 0 : i32
    %47 = arith.cmpi ne, %46, %c0_i32_17 : i32
    scf.if %47 {
      %48 = tpu.iota {dimensions = array<i32: 0>} : vector<16x128xi32>
      %49 = tpu.iota {dimensions = array<i32: 1>} : vector<16x128xi32>
      %c16_i32 = arith.constant 16 : i32
      %50 = arith.muli %1, %c16_i32 : i32
      %51 = vector.broadcast %50 : i32 to vector<16x128xi32>
      %52 = arith.addi %51, %48 : vector<16x128xi32>
      %c128_i32 = arith.constant 128 : i32
      %53 = vector.broadcast %c128_i32 : i32 to vector<16x128xi32>
      %54 = arith.muli %52, %53 : vector<16x128xi32>
      %55 = arith.addi %54, %49 : vector<16x128xi32>
      %c2048_i32 = arith.constant 2048 : i32
      %56 = vector.broadcast %c2048_i32 : i32 to vector<16x128xi32>
      %57 = arith.cmpi slt, %55, %56 : vector<16x128xi32>
      %cst_18 = arith.constant 0.000000e+00 : f32
      %58 = vector.broadcast %cst_18 : f32 to vector<16x128xf32>
      %59 = arith.select %57, %41, %58 : vector<16x128xi1>, vector<16x128xf32>
      %c0_19 = arith.constant 0 : index
      %c0_20 = arith.constant 0 : index
      %c0_21 = arith.constant 0 : index
      %60 = vector.load %arg4[%c0_19, %c0_20, %c0_21] : memref<1x8x128xf32, #tpu.memory_space<vmem>>, vector<1x8x128xf32>
      %61 = vector.shape_cast %60 : vector<1x8x128xf32> to vector<8x128xf32>
      %62 = vector.shape_cast %59 : vector<16x128xf32> to vector<2x8x128xf32>
      %cst_22 = arith.constant dense<0.000000e+00> : vector<8x128xf32>
      %63 = vector.multi_reduction <add>, %62, %cst_22 [0] : vector<2x8x128xf32> to vector<8x128xf32>
      %64 = arith.addf %61, %63 : vector<8x128xf32>
      %c0_23 = arith.constant 0 : index
      %c0_24 = arith.constant 0 : index
      %c0_25 = arith.constant 0 : index
      %65 = vector.load %arg4[%c0_23, %c0_24, %c0_25] : memref<1x8x128xf32, #tpu.memory_space<vmem>>, vector<1x8x128xf32>
      %66 = vector.shape_cast %65 : vector<1x8x128xf32> to vector<8x128xf32>
      %67 = vector.shape_cast %64 : vector<8x128xf32> to vector<1x8x128xf32>
      tpu.vector_store %arg4[%c0_23, %c0_24, %c0_25], %67 {strides = array<i32>} : memref<1x8x128xf32, #tpu.memory_space<vmem>>, vector<1x8x128xf32>,
    } else {
    }
    return
  }
  func.func @transform_0(%arg0: i32, %arg1: i32) -> (i32, i32) {
    %c1_i32 = arith.constant 1 : i32
    %0 = arith.muli %arg0, %c1_i32 : i32
    %1 = arith.addi %0, %arg1 : i32
    %c0_i32 = arith.constant 0 : i32
    %2 = arith.minsi %1, %c0_i32 : i32
    %c0_i32_0 = arith.constant 0 : i32
    %c0_i32_1 = arith.constant 0 : i32
    return %2, %c0_i32_0 : i32, i32
  }
  func.func @transform_1(%arg0: i32, %arg1: i32) -> (i32, i32) {
    %c1_i32 = arith.constant 1 : i32
    %0 = arith.muli %arg0, %c1_i32 : i32
    %1 = arith.addi %0, %arg1 : i32
    %c0_i32 = arith.constant 0 : i32
    %2 = arith.minsi %1, %c0_i32 : i32
    %c0_i32_0 = arith.constant 0 : i32
    %c0_i32_1 = arith.constant 0 : i32
    return %2, %c0_i32_0 : i32, i32
  }
  func.func @transform_2(%arg0: i32, %arg1: i32) -> (i32, i32, i32) {
    %c0_i32 = arith.constant 0 : i32
    %c0_i32_0 = arith.constant 0 : i32
    %c0_i32_1 = arith.constant 0 : i32
    return %arg0, %c0_i32, %c0_i32_0 : i32, i32, i32
  }
}

</mosaic_0001>

<bundles_post_ra>
// kernel: tpu_custom_call.1
= control target key start
LH: loop header
LB: loop body
LE: loop exit
PB: predicated region body
PF: predicated region fallthrough
CT: control target
= control target key end

     0   :  { %7 = vsyncpa [#allocation3], 0  ;;  %s973_s0 = inlined_call_operand.hbm [shape: f32[16,128], index: 0, kind: input, shape index: {}]   ;;  %s974_s1 = inlined_call_operand.hbm [shape: f32[16,128], index: 1, kind: input, shape index: {}]   ;;  %s975_s2 = inlined_call_operand.hbm [shape: f32[2,8,128], index: 2, kind: output, shape index: {}]  }
   0x1   :  { %9 = vsyncpa [#allocation3 + $0x1], 0 }
   0x2   :  { %10 = vsyncpa [#allocation6], 0 }
   0x3   :  { %12 = vsyncpa [#allocation6 + $0x1], 0 }
   0x4   :  { %13 = vsyncpa [#allocation4], 0 }
   0x5   :  { %15 = vsyncpa [#allocation4 + $0x1], 0  ;;  %s779_s9 = smov 0   ;;  %s781_s10 = smov 0  }
   0x6   :  { %s783_s11 = smov 0   ;;  %s785_s12 = smov 0  }
   0x7   :  { %s787_s13 = smov 0   ;;  %s789_s14 = smov 0  }
   0x8   :  { %s791_s15 = smov 0   ;;  %s793_s16 = smov 0  }
   0x9 LB: > { %s466_s17 = sadd.s32 4294967295, %s756_s16   ;;  %s467_s18 = sadd.s32 4294967294, %s756_s16   ;;  %s756_s16 = sphi %s793_s16, %s21_s16   ;;  %s752_s15 = sphi %s791_s15, %s994_s15   ;;  %s748_s14 = sphi %s789_s14, %s993_s14   ;;  %s744_s13 = sphi %s787_s13, %s963_s13   ;;  %s740_s12 = sphi %s785_s12, %s992_s12   ;;  %s736_s11 = sphi %s783_s11, %s991_s11   ;;  %s732_s10 = sphi %s781_s10, %s990_s10   ;;  %s728_s9 = sphi %s779_s9, %s989_s9  }
   0xa   : > { %s33_s19 = sadd.s32 1, %s752_s15  ;;  %p725_p1 = scmp.ne.s32.totalorder %s744_s13, 0 }
   0xb   : > { %p35_p0 = scmp.ge.s32.totalorder %s33_s19, 2  ;;  %p54_p2 = scmp.eq.s32.totalorder %s756_s16, 0 }
   0xc   : > { %p59_p3 = scmp.ne.s32.totalorder %s744_s13, %s740_s12  ;;  %p60_p5 = scmp.eq.s32.totalorder %s466_s17, 0 }
   0xd   : > { %s996_s19 = smov (%p35_p0, %s33_s19), 0  ;;  %p825_p4 = por %p725_p1, %p54_p2 }
   0xe   : > { %p829_p6 = por %p60_p5, %p59_p3  ;;  %s101_s22 = ssub.s32 %s752_s15, %s996_s19 }
   0xf   : > { %p102_p7 = scmp.eq.s32.totalorder %s101_s22, 0  ;;  %s104_s23 = sadd.s32 1, %s736_s11 }
  0x10   : > { %s979_s21 = scalar_select %p829_p6, 1, 0 }
  0x11   : > { %s837_s24 = scalar_select %p102_p7, %s736_s11, %s104_s23  }
  0x12   : > { %p114_p8 = scmp.ne.s32.totalorder %s736_s11, %s732_s10  ;;  %p115_p9 = scmp.eq.s32.totalorder %s466_s17, 1 }
  0x13   : > { %p120_p10 = scmp.ne.s32.totalorder %s732_s10, %s728_s9  ;;  %p121_p11 = scmp.eq.s32.totalorder %s467_s18, 1 }
  0x14   : > { %p843_p12 = por %p115_p9, %p114_p8  ;;  %p506_p1 = scmp.lt.s32.totalorder %s756_s16, 2 }
  0x15   : > { %p848_p0 = por %p121_p11, %p120_p10  ;;  %s758_s27 = smov [#allocation2]  }
  0x16   : > { %s980_s25 = scalar_select %p843_p12, 1, 0 }
  0x17   : > { %s981_s26 = scalar_select %p848_p0, 1, 0 }
  0x18   : > { %s155_s28 = sshll.u32 %s758_s27, 4  ;;  %p855_p2 = pnand %p506_p1, %p825_p4  ;;  %s156_s28 = int_to_ptr.vmem [resolvable:$true] %s155_s28 }
  0x19   : > { %s595_s4 = scalar_lea.hbm %s973_s0, 256 }
  0x1a   : > { %p596_p3 = scmp.ne.s32.totalorder %s973_s0, %s595_s4  ;;  %p597_p5 = pneg %p855_p2 }
  0x1b   : > { %p602_p8 = scmp.lt.s32.totalorder %s595_s4, %s595_s4 }
  0x1c   : > { %p598_p7 = pnand %p597_p5, %p596_p3 }
  0x1e   : > { %p599_p4 = pneg %p598_p7 }
  0x20   : > { %p604_p9 = pnand %p602_p8, %p599_p4 }
  0x22   : > { %607 = shalt.err (!%p604_p9)
}
  0x23   : > { %s608_s7 = scalar_lea.vmem %s156_s28, 256  ;;  %s615_s8 = scalar_lea.vmem %s156_s28, 512 }
  0x24   : > { %p609_p10 = scmp.ne.s32.totalorder %s156_s28, %s608_s7  ;;  %p616_p13 = scmp.lt.s32.totalorder %s156_s28, %s156_s28 }
  0x25   : > { %p617_p0 = scmp.lt.s32.totalorder %s615_s8, %s608_s7 }
  0x26   : > { %p611_p11 = pnand %p609_p10, %p597_p5 }
  0x27   : > { %p618_p12 = por %p617_p0, %p616_p13 }
  0x28   : > { %p612_p1 = pneg %p611_p11 }
  0x2a   : > { %p619_p6 = pnand %p618_p12, %p612_p1 }
  0x2c   : > { %622 = shalt.err (!%p619_p6)
}
  0x2d   : > { %s759_s12 = smov 128   ;;  %s760_s17 = smov 8  }
  0x2e   : > { %498 = dma.hbm_to_vmem [thread:$0]  (!%p855_p2), %s973_s0, 256, %s156_s28, [#allocation3], %s759_s12, %s759_s12, %s760_s17  }
  0x2f   : > { %p476_p3 = scmp.ge.s32.totalorder %s756_s16, 1  ;;  %p187_p7 = scmp.lt.s32.totalorder %s756_s16, 3 }
  0x30   : > { %s761_s23 = smov [#allocation5]   ;;  %s623_s4 = scalar_lea.hbm %s974_s1, 256 }
  0x31   : > { %p880_p4 = pnand %p476_p3, %p187_p7  ;;  %s179_s27 = sshll.u32 %s761_s23, 4  ;;  %s180_s27 = int_to_ptr.vmem [resolvable:$true] %s179_s27 }
  0x32   : > { %p624_p6 = scmp.ne.s32.totalorder %s974_s1, %s623_s4  ;;  %p630_p0 = scmp.lt.s32.totalorder %s623_s4, %s623_s4 }
  0x33   : > { %s983_s22 = scalar_select %p880_p4, 1, 0 }
  0x34   : > { %p626_p12 = pnand %p624_p6, %p597_p5 }
  0x36   : > { %p627_p13 = pneg %p626_p12 }
  0x38   : > { %p632_p8 = pnand %p630_p0, %p627_p13 }
  0x3a   : > { %635 = shalt.err (!%p632_p8)
}
  0x3b   : > { %s636_s28 = scalar_lea.vmem %s180_s27, 256  ;;  %s643_s7 = scalar_lea.vmem %s180_s27, 512 }
  0x3c   : > { %p637_p9 = scmp.ne.s32.totalorder %s180_s27, %s636_s28  ;;  %p644_p1 = scmp.lt.s32.totalorder %s180_s27, %s180_s27 }
  0x3d   : > { %p645_p3 = scmp.lt.s32.totalorder %s643_s7, %s636_s28 }
  0x3e   : > { %p639_p10 = pnand %p637_p9, %p597_p5 }
  0x3f   : > { %p646_p7 = por %p645_p3, %p644_p1 }
  0x40   : > { %p640_p11 = pneg %p639_p10 }
  0x42   : > { %p647_p4 = pnand %p646_p7, %p640_p11 }
  0x44   : > { %650 = shalt.err (!%p647_p4)
}
  0x45   : > { %501 = dma.hbm_to_vmem [thread:$0]  (!%p855_p2), %s974_s1, 256, %s180_s27, [#allocation6], %s759_s12, %s759_s12, %s760_s17  }
  0x46   : > { %p984_p6 = scmp.ne.s32.totalorder %s983_s22, 0 }
  0x47   : > { %s193_s20 = sand.u32 (!%p984_p6), 1, %s744_s13   ;;  %p985_p5 = scmp.ne.s32.totalorder (!%p984_p6), %s979_s21, 0 }
  0x48   : > { %191 = sbr.rel (%p984_p6) target bundleno = 186 (0xba), region = 28  ;;  %s477_s23 = sshll.u32 (!%p984_p6), %s193_s20, 4 }
  0x49   : > { %s194_s30 = scalar_lea.sflag (!%p984_p6), [#allocation3], %s193_s20  ;;  %s197_s3 = scalar_lea.vmem (!%p984_p6), [#allocation2], %s477_s23 }
  0x4d   : > { %714 = dma.done.wait (%p985_p5), %s194_s30, 256  }
  0x4e   : > { %716 = vsyncadd (%p985_p5), %s194_s30, 4294967040  ;;  %s203_s29 = scalar_lea.sflag [#allocation6], %s193_s20  ;;  %s206_s4 = scalar_lea.vmem [#allocation5], %s477_s23 }
  0x4f   : > { %718 = dma.done.wait (%p985_p5), %s203_s29, 256  }
  0x50   : > { %720 = vsyncadd (%p985_p5), %s203_s29, 4294967040  ;;  %s229_s12 = sand.u32 1, %s732_s10   ;;  %v762_v0 = vmov 0.0   ;;  %v246_v1 = vld [vmem:[%s197_s3] sm:$0xff]  ;;  %v247_v2 = vld [vmem:[%s197_s3 + $0x8] sm:$0xff]  ;;  %p480_p2 = scmp.ge.s32.totalorder %s748_s14, 0 }
  0x51   : > { %s479_s17 = sshll.u32 %s229_s12, 3  ;;  %v250_v3 = vand.u32 2147483647, %v246_v1  ;;  %v251_v4 = vand.u32 2147483647, %v247_v2  ;;  %v248_v15 = vld [vmem:[%s206_s4] sm:$0xff] }
  0x52   : > { %s915_s22 = scalar_lea.vmem [#allocation7], %s479_s17  ;;  %v249_v17 = vld [vmem:[%s206_s4 + $0x8] sm:$0xff]  ;;  %v280_v20 = vsub.f32 0.0, %v246_v1  ;;  %v281_v22 = vsub.f32 0.0, %v247_v2  ;;  %v308_v23 = vsub.f32 1.0, %v248_v15  ;;  %v276_v25 = vmin.f32 %v246_v1, 0.0 }
  0x53   : > { %245 = vst [vmem:[%s915_s22] sm:$0xff] %v762_v0  ;;  %v252_v5 = vsub.f32 0.0, %v250_v3  ;;  %v253_v6 = vsub.f32 0.0, %v251_v4  ;;  %v309_v26 = vsub.f32 1.0, %v249_v17  ;;  %v277_v29 = vmin.f32 %v247_v2, 0.0 }
  0x54   : > { %v282_v30 = vmin.f32 %v280_v20, 0.0  ;;  %v283_v33 = vmin.f32 %v281_v22, 0.0  ;;  %vm292_vm2 = vcmp.ge.f32.partialorder %v246_v1, 0.0  ;;  %vm293_vm3 = vcmp.ge.f32.partialorder %v247_v2, 0.0 }
  0x55   : > { %v254_v7 = vmul.f32 1.442695, %v252_v5  ;;  %v256_v8 = vmul.f32 1.442695, %v253_v6  ;;  %v304_v36 = vmul.f32 0.25, %v248_v15  ;;  %v310_v37 = vmul.f32 0.75, %v308_v23 }
  0x56   : > { %v305_v41 = vmul.f32 0.25, %v249_v17  ;;  %v311_v42 = vmul.f32 0.75, %v309_v26 }
  0x57   : > { %583 = vpow2.f32 %v254_v7 }
  0x58   : > { %585 = vpow2.f32 %v256_v8 }
  0x64   : > { %v584_v9 = vpop.eup %583 }
  0x65   : > { %v586_v10 = vpop.eup %585  ;;  %v258_v11 = vadd.f32 1.0, %v584_v9  ;;  %v261_v13 = vmul.f32 -0.5, %v584_v9  ;;  %v264_v18 = vand.u32 2147483647, %v584_v9 }
  0x66   : > { %v267_v12 = vadd.f32 1.0, %v586_v10  ;;  %v270_v14 = vmul.f32 -0.5, %v586_v10  ;;  %v273_v21 = vand.u32 2147483647, %v586_v10 }
  0x67   : > { %587 = vlog2.f32 %v258_v11  ;;  %v262_v16 = vadd.f32 1.0, %v261_v13  ;;  %vm265_vm0 = vcmp.lt.f32.partialorder %v264_v18, 0.0004427343 }
  0x68   : > { %589 = vlog2.f32 %v267_v12  ;;  %v271_v19 = vadd.f32 1.0, %v270_v14  ;;  %vm274_vm1 = vcmp.lt.f32.partialorder %v273_v21, 0.0004427343 }
  0x69   : > { %591 = vrcp.f32 %v258_v11  ;;  %v263_v24 = vmul.f32 %v584_v9, %v262_v16 }
  0x6a   : > { %593 = vrcp.f32 %v267_v12  ;;  %v272_v28 = vmul.f32 %v586_v10, %v271_v19 }
  0x74   : > { %v588_v27 = vpop.eup %587 }
  0x75   : > { %v590_v31 = vpop.eup %589  ;;  %v260_v32 = vmul.f32 0.6931472, %v588_v27 }
  0x76   : > { %v592_v34 = vpop.eup %591  ;;  %v269_v35 = vmul.f32 0.6931472, %v590_v31 }
  0x77   : > { %v594_v38 = vpop.eup %593  ;;  %v266_v39 = vsel %vm265_vm0, %v263_v24, %v260_v32  ;;  %v294_v40 = vmul.f32 %v592_v34, %v584_v9 }
  0x78   : > { %v275_v43 = vsel %vm274_vm1, %v272_v28, %v269_v35  ;;  %v278_v44 = vsub.f32 %v276_v25, %v266_v39  ;;  %v284_v45 = vsub.f32 %v282_v30, %v266_v39  ;;  %v295_v46 = vmul.f32 %v594_v38, %v586_v10 }
  0x79   : > { %v279_v47 = vsub.f32 %v277_v29, %v275_v43  ;;  %v285_v48 = vsub.f32 %v283_v33, %v275_v43  ;;  %v296_v49 = vsel %vm292_vm2, %v592_v34, %v294_v40 }
  0x7a   : > { %v297_v50 = vsel %vm293_vm3, %v594_v38, %v295_v46  ;;  %v298_v51 = vsub.f32 %v248_v15, %v296_v49  ;;  %v306_v52 = vmul.f32 %v304_v36, %v278_v44  ;;  %v312_v53 = vmul.f32 %v310_v37, %v284_v45 }
  0x7b   : > { %v299_v54 = vsub.f32 %v249_v17, %v297_v50  ;;  %v307_v55 = vmul.f32 %v305_v41, %v279_v47  ;;  %v313_v56 = vmul.f32 %v311_v42, %v285_v48 }
  0x7c   : > { %v300_v57 = vmul.f32 %v298_v51, %v298_v51  ;;  %v314_v58 = vadd.f32 %v312_v53, %v306_v52 }
  0x7d   : > { %v301_v59 = vmul.f32 %v299_v54, %v299_v54  ;;  %v315_v60 = vadd.f32 %v313_v56, %v307_v55  ;;  %321 = sbr.rel (%p480_p2) target bundleno = 136 (0x88), region = 44 }
  0x7e   : > { %v302_v61 = vsub.f32 0.0, %v300_v57 }
  0x7f   : > { %v303_v62 = vsub.f32 0.0, %v301_v59 }
  0x80   : > { %v316_v63 = vmul.f32 %v314_v58, %v302_v61 }
  0x81   : > { %v317_v0 = vmul.f32 %v315_v60, %v303_v62 }
  0x82   : > { %v322_v1 = vld [vmem:[%s915_s22] sm:$0xff] }
  0x83   : > { %v323_v2 = vadd.f32 %v317_v0, %v316_v63 }
  0x85   : > { %v324_v3 = vadd.f32 %v323_v2, %v322_v1 }
  0x87   : > { %325 = vst [vmem:[%s915_s22] sm:$0xff] %v324_v3 }
  0x88 PF: > { %p481_p4 = scmp.ne.s32.totalorder %s748_s14, 0 }
  0x89   : > { %s482_s21 = sshll.u32 (!%p481_p4), %s748_s14, 4 }
  0x8a   : > { %329 = sbr.rel (%p481_p4) target bundleno = 162 (0xa2), region = 48 }
  0x8f   : > { %v330_v4 = vlaneseq  ;;  %v336_v5 = vstv %s482_s21  ;;  %v347_v17 = vld [vmem:[%s915_s22] sm:$0xff] }
  0x91   : > { %v331_v6 = vshrl.u32 %v330_v4, 7  ;;  %v334_v8 = vand.u32 127, %v330_v4 }
  0x93   : > { %v332_v7 = vadd.s32 8, %v331_v6  ;;  %v337_v9 = vadd.s32 %v336_v5, %v331_v6 }
  0x95   : > { %v338_v10 = vadd.s32 %v336_v5, %v332_v7  ;;  %v339_v11 = vmul.u32 128, %v337_v9 }
  0x97   : > { %v340_v12 = vmul.u32 128, %v338_v10  ;;  %v341_v13 = vadd.s32 %v339_v11, %v334_v8 }
  0x99   : > { %v342_v14 = vadd.s32 %v340_v12, %v334_v8  ;;  %vm343_vm4 = vcmp.lt.s32.totalorder %v341_v13, 2048 }
  0x9a   : > { %v345_v15 = vsel %vm343_vm4, %v316_v63, 0.0 }
  0x9b   : > { %vm344_vm5 = vcmp.lt.s32.totalorder %v342_v14, 2048 }
  0x9c   : > { %v346_v16 = vsel %vm344_vm5, %v317_v0, 0.0 }
  0x9d   : > { %v348_v18 = vadd.f32 %v346_v16, %v345_v15 }
  0x9f   : > { %v349_v19 = vadd.f32 %v348_v18, %v347_v17 }
  0xa1   : > { %350 = vst [vmem:[%s915_s22] sm:$0xff] %v349_v19 }
  0xa2 PF: > { %s484_s27 = sshll.u32 %s748_s14, 7  ;;  %s365_s7 = sshll.u32 %s915_s22, 4  ;;  %s366_s7 = int_to_ptr.vmem [resolvable:$true] %s365_s7 }
  0xa3   : > { %s363_s28 = scalar_lea.hbm %s975_s2, %s484_s27  ;;  %s352_s8 = scalar_lea.sflag [#allocation4], %s229_s12 }
  0xa4   : > { %s651_s18 = scalar_lea.vmem %s366_s7, 128  ;;  %p986_p13 = scmp.ne.s32.totalorder %s980_s25, 0 }
  0xa5   : > { %p652_p12 = scmp.ne.s32.totalorder %s366_s7, %s651_s18  ;;  %s763_s20 = smov [#allocation7]  }
  0xa6   : > { %s655_s23 = sshll.u32 %s763_s20, 4  ;;  %s656_s23 = int_to_ptr.vmem [resolvable:$false] %s655_s23 }
  0xa7   : > { %p653_p0 = pnand %p652_p12, %p986_p13  ;;  %s657_s30 = scalar_lea.vmem %s656_s23, 256 }
  0xa8   : > { %p658_p9 = scmp.lt.s32.totalorder %s366_s7, %s656_s23  ;;  %p659_p10 = scmp.lt.s32.totalorder %s657_s30, %s651_s18 }
  0xa9   : > { %p654_p8 = pneg %p653_p0 }
  0xaa   : > { %p660_p11 = por %p659_p10, %p658_p9 }
  0xac   : > { %p661_p1 = pnand %p660_p11, %p654_p8 }
  0xae   : > { %664 = shalt.err (!%p661_p1)
}
  0xaf   : > { %s665_s14 = scalar_lea.hbm %s363_s28, 128  ;;  %s669_s4 = scalar_lea.hbm %s975_s2, 256 }
  0xb0   : > { %p666_p3 = scmp.ne.s32.totalorder %s363_s28, %s665_s14  ;;  %p670_p5 = scmp.lt.s32.totalorder %s363_s28, %s975_s2 }
  0xb1   : > { %p671_p2 = scmp.lt.s32.totalorder %s669_s4, %s665_s14 }
  0xb2   : > { %p667_p7 = pnand %p666_p3, %p986_p13 }
  0xb3   : > { %p672_p4 = por %p671_p2, %p670_p5 }
  0xb4   : > { %p668_p6 = pneg %p667_p7 }
  0xb6   : > { %p673_p12 = pnand %p672_p4, %p668_p6 }
  0xb8   : > { %676 = shalt.err (!%p673_p12)
}
  0xb9   : > { %493 = dma.vmem_to_hbm [thread:$0]  (%p986_p13), %s366_s7, 128, %s363_s28, %s352_s8  }
  0xba PF: > { %s377_s22 = sand.u32 1, %s728_s9   ;;  %p987_p0 = scmp.ne.s32.totalorder %s981_s26, 0 }
  0xbb   : > { %p988_p8 = scmp.ge.s32.totalorder %s756_s16, 2  ;;  %s378_s21 = scalar_lea.sflag [#allocation4], %s377_s22 }
  0xbd   : > { %p503_p9 = pnand %p988_p8, %p987_p0 }
  0xbf   : > { %p504_p10 = pneg %p503_p9 }
  0xc1   : > { %722 = dma.done.wait (%p504_p10), %s378_s21, 128  }
  0xc2   : > { %724 = vsyncadd (%p504_p10), %s378_s21, 4294967168  ;;  %s21_s16 = sadd.s32 1, %s756_s16   ;;  %s989_s9 = smov %s732_s10 }
  0xc3   : > { %p18_p11 = scmp.ge.s32.totalorder %s21_s16, 4   ;;  %s990_s10 = smov %s736_s11 }
  0xc4   : > { %s991_s11 = smov %s837_s24  ;;  %s992_s12 = smov %s744_s13 }
  0xc5   : > { %s963_s13 = smov 0   ;;  %s993_s14 = smov %s752_s15 }
  0xc6   : > { %s994_s15 = smov %s996_s19  ;;  %20 = sbr.rel (!%p18_p11) target bundleno = 9 (0x9), region = 98 }
  0xcb   :  { %383 = vsyncpa [#allocation3], 1 }
  0xcc   :  { %385 = vsyncpa [#allocation3 + $0x1], 1 }
  0xcd   :  { %386 = vsyncpa [#allocation6], 1 }
  0xce   :  { %388 = vsyncpa [#allocation6 + $0x1], 1 }
  0xcf   :  { %389 = vsyncpa [#allocation4], 1 }
  0xd0   :  { %391 = vsyncpa [#allocation4 + $0x1], 1 }

</bundles_post_ra>
